<compile_context>
chip_gen: v7x
topology: tpu7x:2x2x1
jax: 0.10.0
libtpu: 0.0.40
codegen_flags: <defaults>
</compile_context>

<pallas_src>
import functools
import numpy as np
import jax
import jax.numpy as jnp
from jax.experimental import pallas as pl
from jax.experimental.pallas import tpu as pltpu


# ----------------------------- schedule construction (glue, numpy) -----------

def clip_noise_schedule(alphas2, clip_value=0.001):
    alphas2 = np.concatenate([np.ones(1), alphas2], axis=0)
    alphas_step = alphas2[1:] / alphas2[:-1]
    alphas_step = np.clip(alphas_step, a_min=clip_value, a_max=1.0)
    alphas2 = np.cumprod(alphas_step, axis=0)
    return alphas2


def polynomial_schedule(timesteps: int, s=0.0001, power=3.0):
    steps = timesteps + 1
    x = np.linspace(0, steps, steps)
    alphas2 = (1 - np.power(x / steps, power)) ** 2
    alphas2 = clip_noise_schedule(alphas2, clip_value=0.001)
    precision = 1 - 2 * s
    alphas2 = precision * alphas2 + s
    return alphas2


def build_tables(noise_schedule, timesteps, precision):
    if noise_schedule == 'cosine':
        steps = timesteps + 2
        x = np.linspace(0, steps, steps)
        s = 0.008
        alphas_cumprod = np.cos((x / steps + s) / (1 + s) * np.pi * 0.5) ** 2
        alphas_cumprod = alphas_cumprod / alphas_cumprod[0]
        alphas2 = alphas_cumprod
    elif 'polynomial' in noise_schedule:
        splits = noise_schedule.split('_')
        power = float(splits[1]) if len(splits) == 2 else 3.0
        alphas2 = polynomial_schedule(timesteps, s=precision, power=power)
    else:
        raise ValueError(f'Unknown noise schedule: {noise_schedule}')
    alphas2 = np.clip(alphas2, a_min=1e-07, a_max=0.9999)
    sigmas2 = 1 - alphas2
    sigmas2 = np.clip(sigmas2, a_min=1e-07, a_max=0.9999)
    log_alphas2 = np.log(alphas2)
    log_sigmas2 = np.log(sigmas2)
    gamma = -(log_alphas2 - log_sigmas2)
    alphas = np.sqrt(alphas2)
    sigmas = np.sqrt(sigmas2)
    return (gamma.astype(np.float32),
            alphas.astype(np.float32),
            sigmas.astype(np.float32))


# ----------------------------- Pallas kernel ---------------------------------

def _lookup_kernel(t_ref, tables_ref, out_ref, *, timesteps, table_len):
    # t_ref:      (N, 1)     float32  continuous timesteps in ~[0, 1]
    # tables_ref: (R, Lpad)  float32  R table rows, lane-padded (Lpad % 128 == 0)
    # out_ref:    (N, R)     float32  one fused output (gathered rows)
    t = t_ref[...]                                                    # (N, 1)
    # torch.round / jnp.round both round half-to-even -> semantics match
    # (modulo f32 vs f64 at exact .5 boundaries, see header note).
    t_int = jnp.round(t * jnp.float32(timesteps)).astype(jnp.int32)   # (N, 1)
    # Clamp so slightly out-of-range t returns the boundary entry instead of 0.
    t_int = jnp.clip(t_int, 0, table_len - 1)

    n = t.shape[0]
    lpad = tables_ref.shape[1]
    lane_idx = jax.lax.broadcasted_iota(jnp.int32, (n, lpad), 1)      # (N, Lpad)
    onehot = (lane_idx == t_int).astype(jnp.float32)                  # (N, Lpad)

    # Gather-as-matmul on the MXU: contract the lane axis of the one-hot mask
    # against the lane axis of the table -> (N, R) in one vmatmul, f32 acc.
    out_ref[...] = jax.lax.dot_general(
        onehot, tables_ref[...],
        dimension_numbers=(((1,), (1,)), ((), ())),
        preferred_element_type=jnp.float32)


class PredefinedNoiseSchedule1Pallas:
    def __init__(self, noise_schedule, timesteps, precision, task_type=None):
        self.timesteps = timesteps
        self.task_type = task_type
        gamma, alphas, sigmas = build_tables(noise_schedule, timesteps, precision)

        # Plain copies (used by the reference check in the demo).
        self.gamma = jnp.asarray(gamma)     # shape (L,)
        self.alphas = jnp.asarray(alphas)
        self.sigmas = jnp.asarray(sigmas)

        # Lane-padded tables baked once at init (Lpad % 128 == 0).
        L = int(gamma.shape[0])
        Lpad = ((L + 127) // 128) * 128
        self._table_len = L

        def pad_rows(rows):
            out = np.zeros((len(rows), Lpad), dtype=np.float32)
            for r, row in enumerate(rows):
                out[r, :L] = row
            return jnp.asarray(out)

        # Only the rows a given entry point needs -> no wasted compute/DMA.
        self._gamma_table = pad_rows([gamma])                  # (1, Lpad)
        self._alpha_sigma_table = pad_rows([alphas, sigmas])   # (2, Lpad)
        self._all_table = pad_rows([gamma, alphas, sigmas])    # (3, Lpad)

    # ------------------------------------------------------------------ core
    def _lookup(self, t, table):
        """One pallas_call: gather `table` rows at round(t*T) -> (N, R)."""
        t_arr = jnp.asarray(t, jnp.float32)
        orig_shape = t_arr.shape
        t2d = t_arr.reshape(-1, 1)                                    # (N, 1)
        n = t2d.shape[0]
        nrows = table.shape[0]

        kernel = functools.partial(_lookup_kernel,
                                   timesteps=self.timesteps,
                                   table_len=self._table_len)
        vmem_spec = pl.BlockSpec(memory_space=pltpu.MemorySpace.VMEM)

        out = pl.pallas_call(
            kernel,
            out_shape=jax.ShapeDtypeStruct((n, nrows), jnp.float32),
            in_specs=[vmem_spec, vmem_spec],
            out_specs=vmem_spec,
        )(t2d, table)
        return out, orig_shape

    # --------------------------------------------------------------- public
    def forward(self, t):
        out, shape = self._lookup(t, self._gamma_table)               # (N, 1)
        return out[:, 0].reshape(shape)

    def get_alpha_sigma(self, t):
        out, shape = self._lookup(t, self._alpha_sigma_table)         # (N, 2)
        return out[:, 0].reshape(shape), out[:, 1].reshape(shape)

    def lookup_all(self, t):
        """Single launch returning (gamma, alpha, sigma) for the same t."""
        out, shape = self._lookup(t, self._all_table)                 # (N, 3)
        return (out[:, 0].reshape(shape),
                out[:, 1].reshape(shape),
                out[:, 2].reshape(shape))

    __call__ = forward


# ----------------------------- demo / check ----------------------------------

if __name__ == "__main__":
    timesteps = 100
    module = PredefinedNoiseSchedule1Pallas(
        noise_schedule="polynomial_2", timesteps=timesteps, precision=1e-4)

    key = jax.random.PRNGKey(0)
    batch = 8
    t = jax.random.uniform(key, (batch, 1), dtype=jnp.float32)  # t in [0, 1)

    # forward (gamma only)
    out = module(t)
    out = jax.block_until_ready(out)

    # pure-JAX reference (gather)
    t_int = jnp.round(t * timesteps).astype(jnp.int32)
    ref = module.gamma[t_int.reshape(-1)].reshape(t.shape)
    assert out.shape == t.shape
    assert jnp.allclose(out, ref, atol=1e-6), (out, ref)

    # get_alpha_sigma (alpha + sigma, one launch)
    a, s = module.get_alpha_sigma(t)
    jax.block_until_ready((a, s))
    ref_a = module.alphas[t_int.reshape(-1)].reshape(t.shape)
    ref_s = module.sigmas[t_int.reshape(-1)].reshape(t.shape)
    assert jnp.allclose(a, ref_a, atol=1e-6)
    assert jnp.allclose(s, ref_s, atol=1e-6)

    # fused path: all three from a single launch
    g2, a2, s2 = module.lookup_all(t)
    jax.block_until_ready((g2, a2, s2))
    assert jnp.allclose(g2, ref, atol=1e-6)
    assert jnp.allclose(a2, ref_a, atol=1e-6)
    assert jnp.allclose(s2, ref_s, atol=1e-6)

    print("KERNEL_OK")
</pallas_src>

<mosaic_0001>
module attributes {stable_mosaic.version = 11 : i64} {
  func.func @_lookup_kernel(%arg0: memref<8x1xf32, #tpu.memory_space<vmem>>, %arg1: memref<1x128xf32, #tpu.memory_space<vmem>>, %arg2: memref<8x1xf32, #tpu.memory_space<vmem>>) attributes {dimension_semantics = [], scalar_prefetch = 0 : i64, scratch_operands = 0 : i64, tpu.core_type = #tpu.core_type<tc>} {
    %c0 = arith.constant 0 : index
    %c0_0 = arith.constant 0 : index
    %0 = vector.load %arg0[%c0, %c0_0] : memref<8x1xf32, #tpu.memory_space<vmem>>, vector<8x1xf32>
    %cst = arith.constant 1.000000e+02 : f32
    %1 = vector.broadcast %cst : f32 to vector<8x1xf32>
    %2 = arith.mulf %0, %1 : vector<8x1xf32>
    %3 = math.roundeven %2 : vector<8x1xf32>
    %4 = arith.fptosi %3 : vector<8x1xf32> to vector<8x1xi32>
    %c0_i32 = arith.constant 0 : i32
    %c100_i32 = arith.constant 100 : i32
    %5 = vector.broadcast %c0_i32 : i32 to vector<8x1xi32>
    %6 = arith.maxsi %5, %4 : vector<8x1xi32>
    %7 = vector.broadcast %c100_i32 : i32 to vector<8x1xi32>
    %8 = arith.minsi %7, %6 : vector<8x1xi32>
    %9 = tpu.iota {dimensions = array<i32: 1>} : vector<8x128xi32>
    %10 = vector.broadcast %8 : vector<8x1xi32> to vector<8x128xi32>
    %11 = arith.cmpi eq, %9, %10 : vector<8x128xi32>
    %12 = arith.extui %11 : vector<8x128xi1> to vector<8x128xi32>
    %13 = arith.sitofp %12 : vector<8x128xi32> to vector<8x128xf32>
    %c0_1 = arith.constant 0 : index
    %c0_2 = arith.constant 0 : index
    %14 = vector.load %arg1[%c0_1, %c0_2] : memref<1x128xf32, #tpu.memory_space<vmem>>, vector<1x128xf32>
    %cst_3 = arith.constant dense<0.000000e+00> : vector<8x1xf32>
    %15 = tpu.matmul %13, %14, %cst_3 {dimension_numbers = #tpu.dot_dimension_numbers<[1], [1], [0], [0], [0, 0, 1, 0], [], []>} : vector<8x128xf32>, vector<1x128xf32>, vector<8x1xf32> -> vector<8x1xf32>
    %c0_4 = arith.constant 0 : index
    %c0_5 = arith.constant 0 : index
    %16 = vector.load %arg2[%c0_4, %c0_5] : memref<8x1xf32, #tpu.memory_space<vmem>>, vector<8x1xf32>
    tpu.vector_store %arg2[%c0_4, %c0_5], %15 {strides = array<i32>} : memref<8x1xf32, #tpu.memory_space<vmem>>, vector<8x1xf32>,
    return
  }
}

</mosaic_0001>

<bundles_post_ra>
// kernel: tpu_custom_call.1
= control target key start
LH: loop header
LB: loop body
LE: loop exit
PB: predicated region body
PF: predicated region fallthrough
CT: control target
= control target key end

     0   :  { %v50_v0 = vmov 0   ;;  %v18_v6 = vlaneseq  ;;  %v51_v10 = vmov 0.0   ;;  %vm36_vm3 = vcmask 7168   ;;  %s76_s0 = inlined_call_operand.vmem [shape: f32[8,1], index: 0, kind: input, shape index: {}]   ;;  %s77_s1 = inlined_call_operand.vmem [shape: f32[1,128], index: 1, kind: input, shape index: {}]   ;;  %s78_s2 = inlined_call_operand.vmem [shape: f32[8,1], index: 2, kind: output, shape index: {}]  }
   0x1   :  { %49 = vset.pattern.permute.xlu0 %v50_v0  ;;  %v11_v1 = vld [vmem:[%s76_s0] sm:$0xff] }
   0x2   :  { %v12_v2 = vmul.f32 100.0, %v11_v1  ;;  %v19_v7 = vand.u32 127, %v18_v6  ;;  %v43_v9 = vld [vmem:[%s77_s1] ss:$0 sm:$0xff] }
   0x4   :  { %v46_v3 = vcvt.f32.s32 %v12_v2 }
   0x6   :  { %vm14_vm0 = vcmp.gt.s32.totalorder %v46_v3, 0 }
   0x7   :  { %v15_v4 = vsel %vm14_vm0, %v46_v3, 0 }
   0x8   :  { %vm16_vm1 = vcmp.lt.s32.totalorder %v15_v4, 100 }
   0x9   :  { %v17_v5 = vsel %vm16_vm1, %v15_v4, 100 }
   0xa   :  { %21 = vperm.xlu0 %49, %v17_v5  }
  0x89   :  { %v22_v8 = vpop.permute.xlu0 %21 }
  0x8a   :  { %vm23_vm2 = vcmp.eq.s32.totalorder %v19_v7, %v22_v8 }
  0x8b   :  { %v42_v11 = vsel %vm23_vm2, 1.0, %v51_v10 }
  0x8c   :  { %v33_v12 = vmul.f32 %v43_v9, %v42_v11 }
  0x8e   :  { %34 = vadd.xlane.f32.xlu0 %v33_v12 }
 0x11b   :  { %v35_v13 = vpop.xlane.xlu0 %34 }
 0x11c   :  { %37 = vst.msk [vmem:[%s78_s2] sm:$0xff] %vm36_vm3, %v35_v13 }

</bundles_post_ra>
